<compile_context>
chip_gen: v7x
topology: tpu7x:2x2x1
jax: 0.10.0
libtpu: 0.0.40
codegen_flags: <defaults>
</compile_context>

<pallas_src>
import functools

import jax
import jax.numpy as jnp
import numpy as np
from jax import lax
from jax.experimental import pallas as pl
from jax.experimental.pallas import tpu as pltpu


def self_attention_kernel(gamma_ref, x_ref, wt_ref, bt_ref, o_ref, *, c, cq_pad):
    """One batch element per grid step, everything channel-major.

    x_ref  : (1, C, N)        input features, channels on sublanes, tokens on lanes
    wt_ref : (C + 2*cq_pad, C) packed [Wv^T ; Wq^T(pad) ; Wk^T(pad)]  (C_out, C_in)
    bt_ref : (C + 2*cq_pad, 1) packed biases (padded rows are zero)
    o_ref  : (1, C, N)        gamma * attention_out + x
    """
    gamma = gamma_ref[0]
    x_cm = x_ref[0]                                   # (C, N), lane-dense load
    n = x_cm.shape[-1]

    # Single fused channel-major QKV projection (== three 1x1 convs): one MXU
    # matmul + one bias add; no transpose of the activations.
    qkv = jnp.dot(wt_ref[...], x_cm,
                  preferred_element_type=jnp.float32) + bt_ref[...]        # (cpk, N)

    v_cm = qkv[:c, :]                                 # (C, N)       sublane offset 0
    q_cm = qkv[c:c + cq_pad, :]                       # (cq_pad, N)  sublane offset C
    k_cm = qkv[c + cq_pad:c + 2 * cq_pad, :]          # (cq_pad, N)  sublane offset C+cq_pad

    # energy^T[i, j] = k_i . q_j  -- tiny (cq_pad, N) transpose, then a plain NN
    # matmul with a lane-dense (N, N) result (zero-padded rows contribute 0).
    energy_t = jnp.dot(k_cm.T, q_cm,
                       preferred_element_type=jnp.float32)                 # (N, N)

    # torch Softmax(dim=-2) normalizes columns of energy == rows of energy^T
    # -> reduce along lanes.  Normalization is deferred past the V matmul.
    m = jnp.max(energy_t, axis=-1, keepdims=True)                          # (N, 1)
    e = jnp.exp(energy_t - m)                                              # (N, N)

    # Row-sums of e, produced directly as a lane-major row via an MXU reduction
    # (contract the lane axis of e against an all-ones operand).  This keeps the
    # denominator in the right layout to scale V's columns without any relayout.
    l_rows = lax.dot_general(
        jnp.ones((8, n), jnp.float32), e,
        dimension_numbers=(((1,), (1,)), ((), ())),
        preferred_element_type=jnp.float32)                                # (8, N), rows identical
    # N reciprocals (exact; approx=True is available but kept off for the 1e-4 check).
    inv_l = pl.reciprocal(l_rows[0:1, :], approx=False)                    # (1, N)

    # Fold 1/l into V's columns (the contraction index) -> final matmul uses the
    # *unnormalized* e; no (N, N) divide / normalization pass.
    v_scaled = v_cm * inv_l                                                # (C, N)
    out_cm = jnp.dot(v_scaled, e, preferred_element_type=jnp.float32)      # (C, N)

    o_ref[0] = gamma * out_cm + x_cm                  # lane-dense store (N % 128 == 0)


def self_attention(x_nchw, wq, bq, wk, bk, wv, bv, gamma):
    B, C, Wd, Ht = x_nchw.shape
    N = Wd * Ht
    Cq = wq.shape[1]
    cq_pad = ((Cq + 7) // 8) * 8                      # tile-aligned Q/K channel pad
    cpk = C + 2 * cq_pad

    assert C % 8 == 0 and N % 128 == 0, "C must be a multiple of 8 and W*H of 128"
    # TODO(synk): for spatial sizes with N % 128 != 0 (e.g. 14x14), pad tokens to a
    # multiple of 128 with masking so stores stay unmasked lane-dense vst.

    # NCHW -> (B, C, N): a pure reshape, no HBM transpose pass.
    x_cm = x_nchw.reshape(B, C, N)

    # Pack the three 1x1-conv weights channel-major (C_out, C_in): [V ; Qpad ; Kpad].
    wq_p = jnp.pad(wq, ((0, 0), (0, cq_pad - Cq)))    # (C, cq_pad)
    wk_p = jnp.pad(wk, ((0, 0), (0, cq_pad - Cq)))
    bq_p = jnp.pad(bq, ((0, 0), (0, cq_pad - Cq)))    # (1, cq_pad)
    bk_p = jnp.pad(bk, ((0, 0), (0, cq_pad - Cq)))
    w_packT = jnp.concatenate([wv.T, wq_p.T, wk_p.T], axis=0)       # (cpk, C)
    b_packT = jnp.concatenate([bv, bq_p, bk_p], axis=1).T           # (cpk, 1)

    kernel = functools.partial(self_attention_kernel, c=C, cq_pad=cq_pad)

    out_cm = pl.pallas_call(
        kernel,
        out_shape=jax.ShapeDtypeStruct((B, C, N), jnp.float32),
        grid_spec=pltpu.PrefetchScalarGridSpec(
            num_scalar_prefetch=0,
            grid=(B,),                                              # one batch / step
            in_specs=[
                pl.BlockSpec(memory_space=pltpu.SMEM),              # gamma (scalar)
                pl.BlockSpec((1, C, N), lambda b: (b, 0, 0)),       # x, channel-major
                pl.BlockSpec((cpk, C), lambda b: (0, 0)),           # packed weights (resident)
                pl.BlockSpec((cpk, 1), lambda b: (0, 0)),           # packed bias (resident)
            ],
            out_specs=pl.BlockSpec((1, C, N), lambda b: (b, 0, 0)),
        ),
        compiler_params=pltpu.CompilerParams(
            dimension_semantics=("parallel",)),
    )(gamma, x_cm, w_packT, b_packT)

    # (B, C, N) -> NCHW: again a pure reshape.
    return out_cm.reshape(B, C, Wd, Ht)


def self_attention_ref(x, wq, bq, wk, bk, wv, bv, gamma):
    """Pure-JAX reference mirroring the PyTorch forward exactly."""
    B, C, Wd, Ht = x.shape
    N = Wd * Ht
    hp = lax.Precision.HIGHEST
    xf = x.reshape(B, C, N)                                               # (B, C, N)
    # 1x1 conv: out[b, o, n] = sum_c w[c, o] * x[b, c, n] + b[o]
    q = jnp.einsum('co,bcn->bon', wq, xf, precision=hp) + bq.reshape(1, -1, 1)
    k = jnp.einsum('co,bcn->bon', wk, xf, precision=hp) + bk.reshape(1, -1, 1)
    v = jnp.einsum('co,bcn->bon', wv, xf, precision=hp) + bv.reshape(1, -1, 1)
    query = jnp.transpose(q, (0, 2, 1))                                   # (B, N, Cq)
    energy = jnp.einsum('bic,bcj->bij', query, k, precision=hp)           # (B, N, N)
    attn = jax.nn.softmax(energy, axis=-2)
    out = jnp.einsum('bcn,bjn->bcj', v, attn, precision=hp)               # bmm(value, attn^T)
    out = out.reshape(B, C, Wd, Ht)
    return gamma[0] * out + x


if __name__ == "__main__":
    B, C, Wd, Ht = 2, 32, 16, 16      # in_dim = 32 -> query/key channels = 4; N = 256
    Cq = C // 8

    key = jax.random.PRNGKey(0)
    k0, k1, k2, k3, k4, k5, k6 = jax.random.split(key, 7)

    x = jax.random.normal(k0, (B, C, Wd, Ht), dtype=jnp.float32)

    # Conv2d(k=1) weights stored as (C_in, C_out) == transposed/reshaped
    # PyTorch (C_out, C_in, 1, 1) weights.
    wq = jax.random.normal(k1, (C, Cq), dtype=jnp.float32) * 0.1
    bq = jax.random.normal(k2, (1, Cq), dtype=jnp.float32) * 0.1
    wk = jax.random.normal(k3, (C, Cq), dtype=jnp.float32) * 0.1
    bk = jax.random.normal(k4, (1, Cq), dtype=jnp.float32) * 0.1
    wv = jax.random.normal(k5, (C, C), dtype=jnp.float32) * 0.1
    bv = jax.random.normal(k6, (1, C), dtype=jnp.float32) * 0.1
    # nn.Parameter(torch.zeros(1)) in __init__; use a nonzero deterministic value
    # so the attention path is actually exercised.
    gamma = jnp.array([0.5], dtype=jnp.float32)

    out = self_attention(x, wq, bq, wk, bk, wv, bv, gamma)
    out = jax.block_until_ready(out)

    ref = self_attention_ref(x, wq, bq, wk, bk, wv, bv, gamma)
    np.testing.assert_allclose(np.asarray(out), np.asarray(ref), rtol=1e-4, atol=1e-4)

    print("KERNEL_OK")
</pallas_src>

<mosaic_0001>
module attributes {stable_mosaic.version = 11 : i64} {
  func.func @self_attention_kernel(%arg0: i32, %arg1: memref<1xf32, #tpu.memory_space<smem>>, %arg2: memref<1x32x256xf32, #tpu.memory_space<vmem>>, %arg3: memref<48x32xf32, #tpu.memory_space<vmem>>, %arg4: memref<48x1xf32, #tpu.memory_space<vmem>>, %arg5: memref<1x32x256xf32, #tpu.memory_space<vmem>>) attributes {dimension_semantics = [#tpu.dimension_semantics<parallel>], iteration_bounds = array<i64: 2>, scalar_prefetch = 0 : i64, scratch_operands = 0 : i64, tpu.core_type = #tpu.core_type<tc>, window_params = [{transform_indices = @transform_0, window_bounds = array<i64: 1>}, {transform_indices = @transform_1, window_bounds = array<i64: 1, 32, 256>}, {pipeline_mode = #tpu.pipeline_mode<synchronous>, transform_indices = @transform_2, window_bounds = array<i64: 48, 32>}, {pipeline_mode = #tpu.pipeline_mode<synchronous>, transform_indices = @transform_3, window_bounds = array<i64: 48, 1>}, {transform_indices = @transform_4, window_bounds = array<i64: 1, 32, 256>}]} {
    %c0 = arith.constant 0 : index
    %0 = memref.load %arg1[%c0] : memref<1xf32, #tpu.memory_space<smem>>
    %c0_0 = arith.constant 0 : index
    %c0_1 = arith.constant 0 : index
    %c0_2 = arith.constant 0 : index
    %1 = vector.load %arg2[%c0_0, %c0_1, %c0_2] : memref<1x32x256xf32, #tpu.memory_space<vmem>>, vector<1x32x256xf32>
    %2 = vector.shape_cast %1 : vector<1x32x256xf32> to vector<32x256xf32>
    %c0_3 = arith.constant 0 : index
    %c0_4 = arith.constant 0 : index
    %3 = vector.load %arg3[%c0_3, %c0_4] : memref<48x32xf32, #tpu.memory_space<vmem>>, vector<48x32xf32>
    %cst = arith.constant dense<0.000000e+00> : vector<48x256xf32>
    %4 = tpu.matmul %3, %2, %cst {dimension_numbers = #tpu.dot_dimension_numbers<[1], [0], [0], [1], [0, 0, 1, 1], [], []>} : vector<48x32xf32>, vector<32x256xf32>, vector<48x256xf32> -> vector<48x256xf32>
    %c0_5 = arith.constant 0 : index
    %c0_6 = arith.constant 0 : index
    %5 = vector.load %arg4[%c0_5, %c0_6] : memref<48x1xf32, #tpu.memory_space<vmem>>, vector<48x1xf32>
    %6 = vector.broadcast %5 : vector<48x1xf32> to vector<48x256xf32>
    %7 = arith.addf %4, %6 : vector<48x256xf32>
    %8 = vector.extract_strided_slice %7 {offsets = [0, 0], sizes = [32, 256], strides = [1, 1]} : vector<48x256xf32> to vector<32x256xf32>
    %9 = vector.extract_strided_slice %7 {offsets = [32, 0], sizes = [8, 256], strides = [1, 1]} : vector<48x256xf32> to vector<8x256xf32>
    %10 = vector.extract_strided_slice %7 {offsets = [40, 0], sizes = [8, 256], strides = [1, 1]} : vector<48x256xf32> to vector<8x256xf32>
    %11 = tpu.transpose %10, [1, 0] : vector<8x256xf32> -> vector<256x8xf32>
    %cst_7 = arith.constant dense<0.000000e+00> : vector<256x256xf32>
    %12 = tpu.matmul %11, %9, %cst_7 {dimension_numbers = #tpu.dot_dimension_numbers<[1], [0], [0], [1], [0, 0, 1, 1], [], []>} : vector<256x8xf32>, vector<8x256xf32>, vector<256x256xf32> -> vector<256x256xf32>
    %cst_8 = arith.constant dense<0xFF800000> : vector<256xf32>
    %13 = vector.multi_reduction <maximumf>, %12, %cst_8 [1] : vector<256x256xf32> to vector<256xf32>
    %14 = vector.shape_cast %13 : vector<256xf32> to vector<256x1xf32>
    %15 = vector.broadcast %14 : vector<256x1xf32> to vector<256x256xf32>
    %16 = arith.subf %12, %15 : vector<256x256xf32>
    %17 = math.exp %16 : vector<256x256xf32>
    %cst_9 = arith.constant 1.000000e+00 : f32
    %18 = vector.broadcast %cst_9 : f32 to vector<8x256xf32>
    %cst_10 = arith.constant dense<0.000000e+00> : vector<8x256xf32>
    %19 = tpu.matmul %18, %17, %cst_10 {dimension_numbers = #tpu.dot_dimension_numbers<[1], [1], [0], [0], [0, 0, 1, 0], [], []>} : vector<8x256xf32>, vector<256x256xf32>, vector<8x256xf32> -> vector<8x256xf32>
    %20 = vector.extract_strided_slice %19 {offsets = [0, 0], sizes = [1, 256], strides = [1, 1]} : vector<8x256xf32> to vector<1x256xf32>
    %21 = tpu.reciprocal %20 : vector<1x256xf32> -> vector<1x256xf32>
    %22 = vector.broadcast %21 : vector<1x256xf32> to vector<32x256xf32>
    %23 = arith.mulf %8, %22 : vector<32x256xf32>
    %cst_11 = arith.constant dense<0.000000e+00> : vector<32x256xf32>
    %24 = tpu.matmul %23, %17, %cst_11 {dimension_numbers = #tpu.dot_dimension_numbers<[1], [0], [0], [1], [0, 0, 1, 1], [], []>} : vector<32x256xf32>, vector<256x256xf32>, vector<32x256xf32> -> vector<32x256xf32>
    %25 = vector.broadcast %0 : f32 to vector<32x256xf32>
    %26 = arith.mulf %25, %24 : vector<32x256xf32>
    %27 = arith.addf %26, %2 : vector<32x256xf32>
    %c0_12 = arith.constant 0 : index
    %c0_13 = arith.constant 0 : index
    %c0_14 = arith.constant 0 : index
    %28 = vector.load %arg5[%c0_12, %c0_13, %c0_14] : memref<1x32x256xf32, #tpu.memory_space<vmem>>, vector<1x32x256xf32>
    %29 = vector.shape_cast %28 : vector<1x32x256xf32> to vector<32x256xf32>
    %30 = vector.shape_cast %27 : vector<32x256xf32> to vector<1x32x256xf32>
    tpu.vector_store %arg5[%c0_12, %c0_13, %c0_14], %30 {strides = array<i32>} : memref<1x32x256xf32, #tpu.memory_space<vmem>>, vector<1x32x256xf32>,
    return
  }
  func.func @transform_0(%arg0: i32) -> i32 {
    %c0_i32 = arith.constant 0 : i32
    %c0_i32_0 = arith.constant 0 : i32
    return %c0_i32 : i32
  }
  func.func @transform_1(%arg0: i32) -> (i32, i32, i32) {
    %c0_i32 = arith.constant 0 : i32
    %c0_i32_0 = arith.constant 0 : i32
    %c0_i32_1 = arith.constant 0 : i32
    return %arg0, %c0_i32, %c0_i32_0 : i32, i32, i32
  }
  func.func @transform_2(%arg0: i32) -> (i32, i32) {
    %c0_i32 = arith.constant 0 : i32
    %c0_i32_0 = arith.constant 0 : i32
    %c0_i32_1 = arith.constant 0 : i32
    return %c0_i32, %c0_i32_0 : i32, i32
  }
  func.func @transform_3(%arg0: i32) -> (i32, i32) {
    %c0_i32 = arith.constant 0 : i32
    %c0_i32_0 = arith.constant 0 : i32
    %c0_i32_1 = arith.constant 0 : i32
    return %c0_i32, %c0_i32_0 : i32, i32
  }
  func.func @transform_4(%arg0: i32) -> (i32, i32, i32) {
    %c0_i32 = arith.constant 0 : i32
    %c0_i32_0 = arith.constant 0 : i32
    %c0_i32_1 = arith.constant 0 : i32
    return %arg0, %c0_i32, %c0_i32_0 : i32, i32, i32
  }
}

</mosaic_0001>

<bundles_post_ra>
// kernel: tpu_custom_call.1
= control target key start
LH: loop header
LB: loop body
LE: loop exit
PB: predicated region body
PF: predicated region fallthrough
CT: control target
= control target key end

     0   :  { %s2357_s0 = inlined_call_operand.<no memory space> [shape: f32[1], index: 0, kind: input, shape index: {}]   ;;  %s2358_s1 = inlined_call_operand.vmem [shape: f32[2,32,256], index: 1, kind: input, shape index: {}]   ;;  %s2359_s2 = inlined_call_operand.vmem [shape: f32[48,32], index: 2, kind: input, shape index: {}]   ;;  %s2360_s3 = inlined_call_operand.vmem [shape: f32[48,1], index: 3, kind: input, shape index: {}]   ;;  %s2361_s4 = inlined_call_operand.hbm [shape: f32[2,32,256], index: 4, kind: output, shape index: {}]  }
   0x1   :  { %9 = sst [smem:[#allocation2]] %s2357_s0 }
   0x2   :  { %10 = vsyncpa [#allocation4], 0 }
   0x3   :  { %12 = vsyncpa [#allocation4 + $0x1], 0  ;;  %s1825_s17 = smov 0   ;;  %s1827_s18 = smov 0  }
   0x4   :  { %s1829_s19 = smov 0   ;;  %s1831_s20 = smov 0  }
   0x5 LB: > { %s1846_s0 = sadd.s32 4294967295, %s1789_s20   ;;  %s1353_s21 = sadd.s32 4294967294, %s1789_s20   ;;  %s1789_s20 = sphi %s1831_s20, %s2416_s20   ;;  %s1785_s19 = sphi %s1829_s19, %s2415_s19   ;;  %s1781_s18 = sphi %s1827_s18, %s2414_s18   ;;  %s1777_s17 = sphi %s1825_s17, %s2413_s17  }
   0x6   : > { %s1850_s22 = sadd.s32 1, %s1789_s20   ;;  %s114_s23 = sadd.s32 1, %s1785_s19 }
   0x7   : > { %s111_s24 = ssub.s32 %s1789_s20, %s1850_s22  ;;  %p124_p0 = scmp.ne.s32.totalorder %s1785_s19, %s1781_s18 }
   0x8   : > { %p112_p1 = scmp.eq.s32.totalorder %s111_s24, 0  ;;  %p125_p2 = scmp.eq.s32.totalorder %s1846_s0, 1 }
   0x9   : > { %p130_p3 = scmp.ne.s32.totalorder %s1781_s18, %s1777_s17  ;;  %p131_p4 = scmp.eq.s32.totalorder %s1353_s21, 1 }
   0xa   : > { %s1861_s25 = scalar_select %p112_p1, %s1785_s19, %s114_s23  }
   0xb   : > { %p1863_p5 = por %p125_p2, %p124_p0  ;;  %p1867_p6 = por %p131_p4, %p130_p3 }
   0xc   : > { %p1356_p7 = scmp.ge.s32.totalorder %s1789_s20, 1  ;;  %p166_p8 = scmp.lt.s32.totalorder %s1789_s20, 3 }
   0xe   : > { %p167_p9 = pnand %p1356_p7, %p166_p8 }
  0x10   : > { %170 = sbr.rel (%p167_p9) target bundleno = 1384 (0x568), region = 36 }
  0x17   : > { %p192_p10 = scmp.lt.s32.totalorder %s1846_s0, 1  ;;  %v1791_v0 = vmov 0.0   ;;  %v1792_v1 = vmov 0   ;;  %v217_v2 = vld [vmem:[%s2360_s3 + $0x28] sm:$0xff]  ;;  %v216_v3 = vld [vmem:[%s2360_s3 + $0x20] sm:$0xff]  ;;  %vm248_vm0 = vcmask 261120  }
  0x18   : > { %331 = vmatprep.mubr.f32.mxu0 %v1791_v0  ;;  %593 = vmatprep.mubr.f32.mxu1 %v1791_v0  ;;  %v206_v16 = vld [vmem:[%s2359_s2] sm:$0xff]  ;;  %v207_v17 = vld [vmem:[%s2359_s2 + $0x8] sm:$0xff]  ;;  %v208_v18 = vld [vmem:[%s2359_s2 + $0x10] sm:$0xff]  ;;  %vm432_vm1 = vcmask 64512   ;;  %s197_s14 = sld [smem:[#allocation2]]  ;;  %s189_s15 = sand.u32 1, %s1781_s18  }
  0x19   : > { %s193_s28 = scalar_select %p192_p10, %s1846_s0, 1  ;;  %1585 = vset.pattern.permute.xlu0 %v1792_v1  ;;  %v209_v19 = vld [vmem:[%s2359_s2 + $0x18] sm:$0xff]  ;;  %v210_v20 = vld [vmem:[%s2359_s2 + $0x20] sm:$0xff]  ;;  %v211_v21 = vld [vmem:[%s2359_s2 + $0x28] sm:$0xff] }
  0x1a   : > { %245 = vperm.xlu0 %1585, %v217_v2   ;;  %s1357_s16 = sshll.u32 %s189_s15, 6  ;;  %s1404_s23 = sshll.u32 %s1846_s0, 10 }
  0x1b   : > { %s1403_s5 = sshll.u32 %s193_s28, 6  ;;  %s2289_s21 = scalar_lea.vmem [#allocation3], %s1357_s16 }
  0x1c   : > { %s1887_s10 = scalar_lea.vmem %s2358_s1, %s1403_s5  ;;  %s1291_s24 = sshll.u32 %s2289_s21, 4  ;;  %s2309_s24 = int_to_ptr.vmem [resolvable:$true] %s1291_s24 }
  0x1d   : > { %v199_v4 = vld [vmem:[%s1887_s10 + $0x8] sm:$0xff]  ;;  %v201_v5 = vld [vmem:[%s1887_s10 + $0x18] sm:$0xff]  ;;  %v198_v6 = vld [vmem:[%s1887_s10] sm:$0xff]  ;;  %s2307_s30 = scalar_lea.hbm %s2361_s4, %s1404_s23  ;;  %s2316_s0 = scalar_lea.sflag [#allocation4], %s189_s15 }
  0x1e   : > { %v1405_v7 = vpack.c.bf16 %v201_v5, %v199_v4  ;;  %v200_v8 = vld [vmem:[%s1887_s10 + $0x10] sm:$0xff]  ;;  %v203_v9 = vld [vmem:[%s1887_s10 + $0x28] sm:$0xff]  ;;  %v205_v10 = vld [vmem:[%s1887_s10 + $0x38] sm:$0xff]  ;;  %240 = vperm.xlu0 %1585, %v216_v3   ;;  %s1727_s5 = scalar_lea.vmem %s2309_s24, 1024  ;;  %s1794_s6 = smov [#allocation3]  }
  0x1f   : > { %v1407_v11 = vpack.c.bf16 %v200_v8, %v198_v6  ;;  %v1409_v12 = vpack.c.bf16 %v205_v10, %v203_v9  ;;  %v202_v13 = vld [vmem:[%s1887_s10 + $0x20] sm:$0xff]  ;;  %v204_v14 = vld [vmem:[%s1887_s10 + $0x30] sm:$0xff]  ;;  %p1728_p11 = scmp.ne.s32.totalorder %s2309_s24, %s1727_s5  ;;  %s1731_s7 = sshll.u32 %s1794_s6, 4  ;;  %s1732_s7 = int_to_ptr.vmem [resolvable:$false] %s1731_s7 }
  0x20   : > { %1406 = vmatprep.subr.bf16.mxu0 %v1405_v7  ;;  %v1411_v15 = vpack.c.bf16 %v204_v14, %v202_v13  ;;  %s1733_s8 = scalar_lea.vmem %s1732_s7, 2048  ;;  %p1734_p0 = scmp.lt.s32.totalorder %s2309_s24, %s1732_s7 }
  0x21   : > { %1408 = vmatpush1.bf16.msra.mxu0 %v1407_v11  ;;  %p1729_p12 = pnand %p1728_p11, %p1863_p5  ;;  %p1735_p1 = scmp.lt.s32.totalorder %s1733_s8, %s1727_s5 }
  0x22   : > { %1410 = vmatprep.subr.bf16.mxu0 %v1409_v12 }
  0x23   : > { %p1730_p13 = pneg %p1729_p12  ;;  %p1736_p2 = por %p1735_p1, %p1734_p0 }
  0x25   : > { %1412 = vmatpush1.bf16.msra.mxu0 %v1411_v15  ;;  %p1737_p3 = pnand %p1736_p2, %p1730_p13 }
  0x28   : > { %1360 = vmatmul.mubr.msk.f32.vlgmr.msra.gmra.mrb[0].mxu0 %vm248_vm0, %v206_v16 }
  0x29   : > { %337 = vmatprep.mubr.f32.mxu0 %v1791_v0 }
  0x2c   : > { %1361 = vmatmul.mubr.msk.f32.gmra.mrb[2].mxu0 %vm248_vm0, %v207_v17 }
  0x2d   : > { %343 = vmatprep.mubr.f32.mxu0 %v1791_v0 }
  0x30   : > { %1362 = vmatmul.mubr.msk.f32.gmra.mrb[4].mxu0 %vm248_vm0, %v208_v18 }
  0x31   : > { %349 = vmatprep.mubr.f32.mxu0 %v1791_v0 }
  0x34   : > { %1363 = vmatmul.mubr.msk.f32.gmra.mrb[6].mxu0 %vm248_vm0, %v209_v19 }
  0x35   : > { %355 = vmatprep.mubr.f32.mxu0 %v1791_v0 }
  0x38   : > { %1364 = vmatmul.mubr.msk.f32.gmra.mrb[8].mxu0 %vm248_vm0, %v210_v20 }
  0x39   : > { %361 = vmatprep.mubr.f32.mxu0 %v1791_v0 }
  0x3c   : > { %1365 = vmatmul.mubr.msk.f32.gmra.mrb[10].mxu0 %vm248_vm0, %v211_v21 }
  0x99   : > { %v246_v28 = vpop.permute.xlu0 %245 }
  0x9d   : > { %v241_v31 = vpop.permute.xlu0 %240 }
  0xfb   : > { %v1926_v22 = vpop.f32.mrb[0].mxu0 }
  0xfc   : > { %2375 = vst [vmem:[#allocation6_spill] sm:$0xff] %v1926_v22  ;;  %v1928_v23 = vpop.f32.mrb[1].mxu0 }
  0xfd   : > { %2376 = vst [vmem:[#allocation7_spill] sm:$0xff] %v1928_v23 }
  0xff   : > { %v1930_v24 = vpop.f32.mrb[2].mxu0 }
 0x100   : > { %2377 = vst [vmem:[#allocation8_spill] sm:$0xff] %v1930_v24  ;;  %v1932_v25 = vpop.f32.mrb[3].mxu0 }
 0x101   : > { %2378 = vst [vmem:[#allocation9_spill] sm:$0xff] %v1932_v25 }
 0x103   : > { %v1934_v26 = vpop.f32.mrb[4].mxu0 }
 0x104   : > { %2379 = vst [vmem:[#allocation10_spill] sm:$0xff] %v1934_v26  ;;  %v1936_v27 = vpop.f32.mrb[5].mxu0 }
 0x105   : > { %2380 = vst [vmem:[#allocation11_spill] sm:$0xff] %v1936_v27 }
 0x107   : > { %v1938_v29 = vpop.f32.mrb[6].mxu0 }
 0x108   : > { %2381 = vst [vmem:[#allocation12_spill] sm:$0xff] %v1938_v29  ;;  %v1940_v30 = vpop.f32.mrb[7].mxu0 }
 0x109   : > { %2382 = vst [vmem:[#allocation13_spill] sm:$0xff] %v1940_v30 }
 0x10b   : > { %v357_v32 = vpop.f32.mrb[8].mxu0 }
 0x10c   : > { %v359_v33 = vpop.f32.mrb[9].mxu0  ;;  %v358_v35 = vadd.f32 %v357_v32, %v241_v31 }
 0x10d   : > { %v360_v34 = vadd.f32 %v359_v33, %v241_v31 }
 0x10f   : > { %v363_v36 = vpop.f32.mrb[10].mxu0  ;;  %529 = vmatprep.subr.mxu1 %v360_v34 }
 0x110   : > { %v365_v37 = vpop.f32.mrb[11].mxu0  ;;  %530 = vmatpush1.msra.mxu1 %v358_v35  ;;  %v364_v38 = vadd.f32 %v363_v36, %v246_v28 }
 0x111   : > { %v366_v39 = vadd.f32 %v365_v37, %v246_v28 }
 0x112   : > { %368 = vxpose.xlu1.b32.start.end [1/1] (short) %v364_v38, 128 }
 0x14f   : > { %400 = vxpose.xlu1.b32.start.end [1/1] (short) %v366_v39, 128 }
 0x16d   : > { %1586 = vset.pattern.permute.xlu1 %v1792_v1 }
 0x192   : > { %v384_v40 = vpop.trf.xlu1 }
 0x193   : > { %1366 = vmatmul.mubr.msk.f32.vlgmr.msra.gmra.mrb[0].mxu1 %vm432_vm1, %v384_v40 }
 0x194   : > { %599 = vmatprep.mubr.f32.mxu1 %v1791_v0 }
 0x196   : > { %v385_v41 = vpop.trf.xlu1 }
 0x197   : > { %1367 = vmatmul.mubr.msk.f32.gmra.mrb[2].mxu1 %vm432_vm1, %v385_v41 }
 0x198   : > { %605 = vmatprep.mubr.f32.mxu1 %v1791_v0 }
 0x19a   : > { %v386_v42 = vpop.trf.xlu1 }
 0x19b   : > { %1368 = vmatmul.mubr.msk.f32.gmra.mrb[4].mxu1 %vm432_vm1, %v386_v42 }
 0x19c   : > { %611 = vmatprep.mubr.f32.mxu1 %v1791_v0 }
 0x19e   : > { %v387_v43 = vpop.trf.xlu1 }
 0x19f   : > { %1369 = vmatmul.mubr.msk.f32.gmra.mrb[6].mxu1 %vm432_vm1, %v387_v43 }
 0x1a0   : > { %617 = vmatprep.mubr.f32.mxu1 %v1791_v0 }
 0x1a2   : > { %v388_v44 = vpop.trf.xlu1 }
 0x1a3   : > { %1370 = vmatmul.mubr.msk.f32.gmra.mrb[8].mxu1 %vm432_vm1, %v388_v44 }
 0x1a4   : > { %623 = vmatprep.mubr.f32.mxu1 %v1791_v0 }
 0x1a6   : > { %v389_v45 = vpop.trf.xlu1 }
 0x1a7   : > { %1371 = vmatmul.mubr.msk.f32.gmra.mrb[10].mxu1 %vm432_vm1, %v389_v45 }
 0x1a8   : > { %629 = vmatprep.mubr.f32.mxu1 %v1791_v0 }
 0x1aa   : > { %v390_v46 = vpop.trf.xlu1 }
 0x1ab   : > { %1372 = vmatmul.mubr.msk.f32.gmra.mrb[12].mxu1 %vm432_vm1, %v390_v46 }
 0x1ac   : > { %635 = vmatprep.mubr.f32.mxu1 %v1791_v0 }
 0x1ae   : > { %v391_v47 = vpop.trf.xlu1 }
 0x1af   : > { %1373 = vmatmul.mubr.msk.f32.gmra.mrb[14].mxu1 %vm432_vm1, %v391_v47 }
 0x1b0   : > { %641 = vmatprep.mubr.f32.mxu1 %v1791_v0 }
 0x1b2   : > { %v392_v48 = vpop.trf.xlu1 }
 0x1b3   : > { %1374 = vmatmul.mubr.msk.f32.gmra.mrb[16].mxu1 %vm432_vm1, %v392_v48 }
 0x1b4   : > { %647 = vmatprep.mubr.f32.mxu1 %v1791_v0 }
 0x1b6   : > { %v393_v49 = vpop.trf.xlu1 }
 0x1b7   : > { %1375 = vmatmul.mubr.msk.f32.gmra.mrb[18].mxu1 %vm432_vm1, %v393_v49 }
 0x1b8   : > { %653 = vmatprep.mubr.f32.mxu1 %v1791_v0 }
 0x1ba   : > { %v394_v50 = vpop.trf.xlu1 }
 0x1bb   : > { %1376 = vmatmul.mubr.msk.f32.gmra.mrb[20].mxu1 %vm432_vm1, %v394_v50 }
 0x1bc   : > { %659 = vmatprep.mubr.f32.mxu1 %v1791_v0 }
 0x1be   : > { %v395_v51 = vpop.trf.xlu1 }
 0x1bf   : > { %1377 = vmatmul.mubr.msk.f32.gmra.mrb[22].mxu1 %vm432_vm1, %v395_v51 }
 0x1c0   : > { %665 = vmatprep.mubr.f32.mxu1 %v1791_v0 }
 0x1c2   : > { %v396_v52 = vpop.trf.xlu1 }
 0x1c3   : > { %1378 = vmatmul.mubr.msk.f32.gmra.mrb[24].mxu1 %vm432_vm1, %v396_v52 }
 0x1c4   : > { %671 = vmatprep.mubr.f32.mxu1 %v1791_v0 }
 0x1c6   : > { %v397_v53 = vpop.trf.xlu1 }
 0x1c7   : > { %1379 = vmatmul.mubr.msk.f32.gmra.mrb[26].mxu1 %vm432_vm1, %v397_v53 }
 0x1c8   : > { %677 = vmatprep.mubr.f32.mxu1 %v1791_v0 }
 0x1ca   : > { %v398_v54 = vpop.trf.xlu1 }
 0x1cb   : > { %1380 = vmatmul.mubr.msk.f32.gmra.mrb[28].mxu1 %vm432_vm1, %v398_v54 }
 0x1cc   : > { %683 = vmatprep.mubr.f32.mxu1 %v1791_v0 }
 0x1ce   : > { %v399_v55 = vpop.trf.xlu1 }
 0x1cf   : > { %1381 = vmatmul.mubr.msk.f32.gmra.mrb[30].mxu1 %vm432_vm1, %v399_v55  ;;  %v213_v55 = vld [vmem:[%s2360_s3 + $0x8] sm:$0xff] }
 0x1d0   : > { %689 = vmatprep.mubr.f32.mxu1 %v1791_v0 }
 0x1d2   : > { %v416_v56 = vpop.trf.xlu1 }
 0x1d3   : > { %1382 = vmatmul.mubr.msk.f32.gmra.mrb[32].mxu1 %vm432_vm1, %v416_v56 }
 0x1d4   : > { %695 = vmatprep.mubr.f32.mxu1 %v1791_v0 }
 0x1d6   : > { %v417_v57 = vpop.trf.xlu1 }
 0x1d7   : > { %1383 = vmatmul.mubr.msk.f32.gmra.mrb[34].mxu1 %vm432_vm1, %v417_v57 }
 0x1d8   : > { %701 = vmatprep.mubr.f32.mxu1 %v1791_v0 }
 0x1da   : > { %v418_v58 = vpop.trf.xlu1 }
 0x1db   : > { %1384 = vmatmul.mubr.msk.f32.gmra.mrb[36].mxu1 %vm432_vm1, %v418_v58 }
 0x1dc   : > { %707 = vmatprep.mubr.f32.mxu1 %v1791_v0 }
 0x1de   : > { %v419_v59 = vpop.trf.xlu1 }
 0x1df   : > { %1385 = vmatmul.mubr.msk.f32.gmra.mrb[38].mxu1 %vm432_vm1, %v419_v59  ;;  %v215_v59 = vld [vmem:[%s2360_s3 + $0x18] sm:$0xff] }
 0x1e0   : > { %713 = vmatprep.mubr.f32.mxu1 %v1791_v0 }
 0x1e2   : > { %v420_v60 = vpop.trf.xlu1 }
 0x1e3   : > { %1386 = vmatmul.mubr.msk.f32.gmra.mrb[40].mxu1 %vm432_vm1, %v420_v60 }
 0x1e4   : > { %719 = vmatprep.mubr.f32.mxu1 %v1791_v0 }
 0x1e6   : > { %v421_v61 = vpop.trf.xlu1 }
 0x1e7   : > { %1387 = vmatmul.mubr.msk.f32.gmra.mrb[42].mxu1 %vm432_vm1, %v421_v61 }
 0x1e8   : > { %725 = vmatprep.mubr.f32.mxu1 %v1791_v0 }
 0x1ea   : > { %v422_v62 = vpop.trf.xlu1 }
 0x1eb   : > { %1388 = vmatmul.mubr.msk.f32.gmra.mrb[44].mxu1 %vm432_vm1, %v422_v62 }
 0x1ec   : > { %731 = vmatprep.mubr.f32.mxu1 %v1791_v0 }
 0x1ee   : > { %v423_v63 = vpop.trf.xlu1 }
 0x1ef   : > { %1389 = vmatmul.mubr.msk.f32.gmra.mrb[46].mxu1 %vm432_vm1, %v423_v63 }
 0x1f0   : > { %737 = vmatprep.mubr.f32.mxu1 %v1791_v0 }
 0x1f2   : > { %v424_v1 = vpop.trf.xlu1 }
 0x1f3   : > { %1390 = vmatmul.mubr.msk.f32.gmra.mrb[48].mxu1 %vm432_vm1, %v424_v1 }
 0x1f4   : > { %743 = vmatprep.mubr.f32.mxu1 %v1791_v0 }
 0x1f6   : > { %v425_v2 = vpop.trf.xlu1 }
 0x1f7   : > { %1391 = vmatmul.mubr.msk.f32.gmra.mrb[50].mxu1 %vm432_vm1, %v425_v2 }
 0x1f8   : > { %749 = vmatprep.mubr.f32.mxu1 %v1791_v0 }
 0x1fa   : > { %v426_v3 = vpop.trf.xlu1 }
 0x1fb   : > { %1392 = vmatmul.mubr.msk.f32.gmra.mrb[52].mxu1 %vm432_vm1, %v426_v3 }
 0x1fc   : > { %755 = vmatprep.mubr.f32.mxu1 %v1791_v0 }
 0x1fe   : > { %v427_v4 = vpop.trf.xlu1 }
 0x1ff   : > { %1393 = vmatmul.mubr.msk.f32.gmra.mrb[54].mxu1 %vm432_vm1, %v427_v4 }
 0x200   : > { %761 = vmatprep.mubr.f32.mxu1 %v1791_v0 }
 0x202   : > { %v428_v5 = vpop.trf.xlu1 }
 0x203   : > { %1394 = vmatmul.mubr.msk.f32.gmra.mrb[56].mxu1 %vm432_vm1, %v428_v5 }
 0x204   : > { %767 = vmatprep.mubr.f32.mxu1 %v1791_v0 }
 0x206   : > { %v429_v6 = vpop.trf.xlu1 }
 0x207   : > { %1395 = vmatmul.mubr.msk.f32.gmra.mrb[58].mxu1 %vm432_vm1, %v429_v6 }
 0x208   : > { %773 = vmatprep.mubr.f32.mxu1 %v1791_v0 }
 0x20a   : > { %v430_v7 = vpop.trf.xlu1 }
 0x20b   : > { %1396 = vmatmul.mubr.msk.f32.gmra.mrb[60].mxu1 %vm432_vm1, %v430_v7 }
 0x20c   : > { %779 = vmatprep.mubr.f32.mxu1 %v1791_v0 }
 0x20e   : > { %v431_v8 = vpop.trf.xlu1 }
 0x20f   : > { %1397 = vmatmul.mubr.msk.f32.gmra.mrb[62].mxu1 %vm432_vm1, %v431_v8 }
 0x266   : > { %v2006_v9 = vpop.f32.mrb[0].mxu1 }
 0x267   : > { %v2008_v10 = vpop.f32.mrb[1].mxu1 }
 0x268   : > { %v786_v11 = vmax.f32 %v2006_v9, %v2008_v10 }
 0x26a   : > { %787 = vmax.xlane.f32.xlu0 %v786_v11  ;;  %v2012_v12 = vpop.f32.mrb[2].mxu1 }
 0x26b   : > { %v2014_v13 = vpop.f32.mrb[3].mxu1 }
 0x26c   : > { %v789_v14 = vmax.f32 %v2012_v12, %v2014_v13 }
 0x26e   : > { %790 = vmax.xlane.f32.xlu0 %v789_v14  ;;  %v2018_v0 = vpop.f32.mrb[4].mxu1 }
 0x26f   : > { %v2020_v15 = vpop.f32.mrb[5].mxu1 }
 0x270   : > { %v792_v16 = vmax.f32 %v2018_v0, %v2020_v15 }
 0x272   : > { %793 = vmax.xlane.f32.xlu0 %v792_v16  ;;  %v2024_v17 = vpop.f32.mrb[6].mxu1 }
 0x273   : > { %v2026_v18 = vpop.f32.mrb[7].mxu1 }
 0x274   : > { %v795_v19 = vmax.f32 %v2024_v17, %v2026_v18 }
 0x276   : > { %796 = vmax.xlane.f32.xlu0 %v795_v19  ;;  %v2030_v20 = vpop.f32.mrb[8].mxu1 }
 0x277   : > { %v2032_v21 = vpop.f32.mrb[9].mxu1 }
 0x278   : > { %v798_v28 = vmax.f32 %v2030_v20, %v2032_v21 }
 0x27a   : > { %799 = vmax.xlane.f32.xlu0 %v798_v28  ;;  %v2036_v31 = vpop.f32.mrb[10].mxu1 }
 0x27b   : > { %v2038_v32 = vpop.f32.mrb[11].mxu1 }
 0x27c   : > { %v801_v33 = vmax.f32 %v2036_v31, %v2038_v32 }
 0x27e   : > { %802 = vmax.xlane.f32.xlu0 %v801_v33  ;;  %v2042_v34 = vpop.f32.mrb[12].mxu1 }
 0x27f   : > { %v2044_v35 = vpop.f32.mrb[13].mxu1 }
 0x280   : > { %v804_v36 = vmax.f32 %v2042_v34, %v2044_v35 }
 0x282   : > { %805 = vmax.xlane.f32.xlu0 %v804_v36  ;;  %v2048_v37 = vpop.f32.mrb[14].mxu1 }
 0x283   : > { %v2050_v38 = vpop.f32.mrb[15].mxu1 }
 0x284   : > { %v807_v39 = vmax.f32 %v2048_v37, %v2050_v38 }
 0x286   : > { %808 = vmax.xlane.f32.xlu0 %v807_v39  ;;  %v2054_v40 = vpop.f32.mrb[16].mxu1 }
 0x287   : > { %v2056_v41 = vpop.f32.mrb[17].mxu1 }
 0x288   : > { %v810_v42 = vmax.f32 %v2054_v40, %v2056_v41 }
 0x28a   : > { %811 = vmax.xlane.f32.xlu1 %v810_v42  ;;  %v2060_v43 = vpop.f32.mrb[18].mxu1 }
 0x28b   : > { %v2062_v44 = vpop.f32.mrb[19].mxu1 }
 0x28c   : > { %v813_v45 = vmax.f32 %v2060_v43, %v2062_v44 }
 0x28e   : > { %814 = vmax.xlane.f32.xlu0 %v813_v45  ;;  %v2066_v46 = vpop.f32.mrb[20].mxu1 }
 0x28f   : > { %v2068_v47 = vpop.f32.mrb[21].mxu1 }
 0x290   : > { %v816_v48 = vmax.f32 %v2066_v46, %v2068_v47 }
 0x292   : > { %817 = vmax.xlane.f32.xlu0 %v816_v48  ;;  %v2072_v49 = vpop.f32.mrb[22].mxu1 }
 0x293   : > { %v2074_v50 = vpop.f32.mrb[23].mxu1 }
 0x294   : > { %v819_v51 = vmax.f32 %v2072_v49, %v2074_v50 }
 0x296   : > { %820 = vmax.xlane.f32.xlu0 %v819_v51  ;;  %v2078_v52 = vpop.f32.mrb[24].mxu1 }
 0x297   : > { %v2080_v53 = vpop.f32.mrb[25].mxu1 }
 0x298   : > { %v822_v54 = vmax.f32 %v2078_v52, %v2080_v53 }
 0x29a   : > { %823 = vmax.xlane.f32.xlu0 %v822_v54  ;;  %v2087_v56 = vpop.f32.mrb[26].mxu1 }
 0x29b   : > { %v2089_v57 = vpop.f32.mrb[27].mxu1  ;;  %225 = vperm.xlu1 %1586, %v213_v55  }
 0x29c   : > { %v825_v58 = vmax.f32 %v2087_v56, %v2089_v57 }
 0x29e   : > { %826 = vmax.xlane.f32.xlu0 %v825_v58  ;;  %v2096_v60 = vpop.f32.mrb[28].mxu1 }
 0x29f   : > { %v2098_v61 = vpop.f32.mrb[29].mxu1  ;;  %235 = vperm.xlu1 %1586, %v215_v59  }
 0x2a0   : > { %v828_v62 = vmax.f32 %v2096_v60, %v2098_v61 }
 0x2a2   : > { %829 = vmax.xlane.f32.xlu0 %v828_v62  ;;  %v2102_v63 = vpop.f32.mrb[30].mxu1 }
 0x2a3   : > { %v2104_v1 = vpop.f32.mrb[31].mxu1 }
 0x2a4   : > { %v831_v2 = vmax.f32 %v2102_v63, %v2104_v1 }
 0x2a6   : > { %832 = vmax.xlane.f32.xlu0 %v831_v2  ;;  %v2108_v3 = vpop.f32.mrb[32].mxu1 }
 0x2a7   : > { %v2110_v4 = vpop.f32.mrb[33].mxu1 }
 0x2a8   : > { %v834_v5 = vmax.f32 %v2108_v3, %v2110_v4 }
 0x2aa   : > { %835 = vmax.xlane.f32.xlu0 %v834_v5  ;;  %v2114_v6 = vpop.f32.mrb[34].mxu1 }
 0x2ab   : > { %v2116_v7 = vpop.f32.mrb[35].mxu1 }
 0x2ac   : > { %v837_v8 = vmax.f32 %v2114_v6, %v2116_v7 }
 0x2ae   : > { %838 = vmax.xlane.f32.xlu0 %v837_v8  ;;  %v2120_v11 = vpop.f32.mrb[36].mxu1 }
 0x2af   : > { %v2122_v14 = vpop.f32.mrb[37].mxu1 }
 0x2b0   : > { %v840_v16 = vmax.f32 %v2120_v11, %v2122_v14 }
 0x2b2   : > { %841 = vmax.xlane.f32.xlu0 %v840_v16  ;;  %v2126_v19 = vpop.f32.mrb[38].mxu1 }
 0x2b3   : > { %v2128_v28 = vpop.f32.mrb[39].mxu1 }
 0x2b4   : > { %v843_v33 = vmax.f32 %v2126_v19, %v2128_v28 }
 0x2b6   : > { %844 = vmax.xlane.f32.xlu0 %v843_v33  ;;  %v2132_v36 = vpop.f32.mrb[40].mxu1 }
 0x2b7   : > { %v2134_v39 = vpop.f32.mrb[41].mxu1 }
 0x2b8   : > { %v846_v42 = vmax.f32 %v2132_v36, %v2134_v39 }
 0x2ba   : > { %847 = vmax.xlane.f32.xlu0 %v846_v42  ;;  %v2138_v45 = vpop.f32.mrb[42].mxu1 }
 0x2bb   : > { %v2140_v48 = vpop.f32.mrb[43].mxu1 }
 0x2bc   : > { %v849_v51 = vmax.f32 %v2138_v45, %v2140_v48 }
 0x2be   : > { %850 = vmax.xlane.f32.xlu0 %v849_v51  ;;  %v2144_v54 = vpop.f32.mrb[44].mxu1 }
 0x2bf   : > { %v2146_v55 = vpop.f32.mrb[45].mxu1 }
 0x2c0   : > { %v852_v58 = vmax.f32 %v2144_v54, %v2146_v55 }
 0x2c2   : > { %853 = vmax.xlane.f32.xlu0 %v852_v58  ;;  %v2150_v59 = vpop.f32.mrb[46].mxu1 }
 0x2c3   : > { %v2152_v62 = vpop.f32.mrb[47].mxu1 }
 0x2c4   : > { %v855_v2 = vmax.f32 %v2150_v59, %v2152_v62 }
 0x2c6   : > { %856 = vmax.xlane.f32.xlu0 %v855_v2  ;;  %v2156_v5 = vpop.f32.mrb[48].mxu1 }
 0x2c7   : > { %v2158_v8 = vpop.f32.mrb[49].mxu1 }
 0x2c8   : > { %v858_v16 = vmax.f32 %v2156_v5, %v2158_v8 }
 0x2ca   : > { %859 = vmax.xlane.f32.xlu0 %v858_v16  ;;  %v2162_v33 = vpop.f32.mrb[50].mxu1 }
 0x2cb   : > { %v2164_v42 = vpop.f32.mrb[51].mxu1 }
 0x2cc   : > { %v861_v51 = vmax.f32 %v2162_v33, %v2164_v42 }
 0x2ce   : > { %862 = vmax.xlane.f32.xlu0 %v861_v51  ;;  %v2168_v58 = vpop.f32.mrb[52].mxu1 }
 0x2cf   : > { %2383 = vst [vmem:[#allocation14_spill] sm:$0xff] %v2168_v58  ;;  %v2170_v27 = vpop.f32.mrb[53].mxu1 }
 0x2d0   : > { %2384 = vst [vmem:[#allocation15_spill] sm:$0xff] %v2170_v27  ;;  %v864_v2 = vmax.f32 %v2168_v58, %v2170_v27 }
 0x2d2   : > { %865 = vmax.xlane.f32.xlu0 %v864_v2  ;;  %v2174_v23 = vpop.f32.mrb[54].mxu1 }
 0x2d3   : > { %2385 = vst [vmem:[#allocation16_spill] sm:$0xff] %v2174_v23  ;;  %v2176_v30 = vpop.f32.mrb[55].mxu1 }
 0x2d4   : > { %2386 = vst [vmem:[#allocation17_spill] sm:$0xff] %v2176_v30  ;;  %v867_v16 = vmax.f32 %v2174_v23, %v2176_v30 }
 0x2d6   : > { %868 = vmax.xlane.f32.xlu0 %v867_v16  ;;  %v2180_v26 = vpop.f32.mrb[56].mxu1 }
 0x2d7   : > { %2387 = vst [vmem:[#allocation18_spill] sm:$0xff] %v2180_v26  ;;  %v2182_v22 = vpop.f32.mrb[57].mxu1 }
 0x2d8   : > { %2388 = vst [vmem:[#allocation19_spill] sm:$0xff] %v2182_v22  ;;  %v870_v51 = vmax.f32 %v2180_v26, %v2182_v22 }
 0x2da   : > { %871 = vmax.xlane.f32.xlu0 %v870_v51  ;;  %v2186_v29 = vpop.f32.mrb[58].mxu1 }
 0x2db   : > { %2389 = vst [vmem:[#allocation20_spill] sm:$0xff] %v2186_v29  ;;  %v2188_v25 = vpop.f32.mrb[59].mxu1 }
 0x2dc   : > { %2390 = vst [vmem:[#allocation21_spill] sm:$0xff] %v2188_v25  ;;  %v873_v2 = vmax.f32 %v2186_v29, %v2188_v25  ;;  %v212_v29 = vld [vmem:[%s2360_s3] sm:$0xff] }
 0x2de   : > { %874 = vmax.xlane.f32.xlu0 %v873_v2  ;;  %v2192_v24 = vpop.f32.mrb[60].mxu1 }
 0x2df   : > { %2391 = vst [vmem:[#allocation22_spill] sm:$0xff] %v2192_v24  ;;  %v2194_v30 = vpop.f32.mrb[61].mxu1 }
 0x2e0   : > { %2392 = vst [vmem:[#allocation23_spill] sm:$0xff] %v2194_v30  ;;  %v876_v16 = vmax.f32 %v2192_v24, %v2194_v30 }
 0x2e2   : > { %877 = vmax.xlane.f32.xlu0 %v876_v16  ;;  %v2198_v23 = vpop.f32.mrb[62].mxu1 }
 0x2e3   : > { %v2200_v22 = vpop.f32.mrb[63].mxu1 }
 0x2e4   : > { %2393 = vst [vmem:[#allocation24_spill] sm:$0xff] %v2200_v22  ;;  %v879_v51 = vmax.f32 %v2198_v23, %v2200_v22 }
 0x2e6   : > { %880 = vmax.xlane.f32.xlu0 %v879_v51  ;;  %v214_v51 = vld [vmem:[%s2360_s3 + $0x10] sm:$0xff] }
 0x2f7   : > { %v788_v26 = vpop.xlane.xlu0 %787 }
 0x2f8   : > { %v882_v25 = vsub.f32 %v2006_v9, %v788_v26  ;;  %v883_v2 = vsub.f32 %v2008_v10, %v788_v26 }
 0x2fa   : > { %v946_v27 = vmul.f32 1.442695, %v882_v25  ;;  %v948_v30 = vmul.f32 1.442695, %v883_v2 }
 0x2fb   : > { %v791_v16 = vpop.xlane.xlu0 %790 }
 0x2fc   : > { %v884_v24 = vsub.f32 %v2012_v12, %v791_v16  ;;  %v885_v58 = vsub.f32 %v2014_v13, %v791_v16  ;;  %220 = vperm.xlu0 %1585, %v212_v29   ;;  %1587 = vpow2.f32 %v946_v27 }
 0x2fd   : > { %1589 = vpow2.f32 %v948_v30 }
 0x2fe   : > { %v950_v9 = vmul.f32 1.442695, %v884_v24  ;;  %v952_v22 = vmul.f32 1.442695, %v885_v58 }
 0x2ff   : > { %v794_v26 = vpop.xlane.xlu0 %793 }
 0x300   : > { %1591 = vpow2.f32 %v950_v9  ;;  %v886_v10 = vsub.f32 %v2018_v0, %v794_v26  ;;  %v887_v25 = vsub.f32 %v2020_v15, %v794_v26  ;;  %230 = vperm.xlu0 %1585, %v214_v51   ;;  %v1793_v15 = vmov 1.0  }
 0x301   : > { %1593 = vpow2.f32 %v952_v22  ;;  %1138 = vmatprep.mubr.f32.mxu1 %v1793_v15 }
 0x302   : > { %v954_v12 = vmul.f32 1.442695, %v886_v10  ;;  %v956_v2 = vmul.f32 1.442695, %v887_v25 }
 0x303   : > { %v797_v13 = vpop.xlane.xlu0 %796 }
 0x304   : > { %v888_v29 = vsub.f32 %v2024_v17, %v797_v13  ;;  %v889_v16 = vsub.f32 %v2026_v18, %v797_v13  ;;  %1595 = vpow2.f32 %v954_v12 }
 0x305   : > { %1597 = vpow2.f32 %v956_v2 }
 0x306   : > { %v958_v27 = vmul.f32 1.442695, %v888_v29  ;;  %v960_v24 = vmul.f32 1.442695, %v889_v16  ;;  %v1588_v58 = vpop.eup %1587 }
 0x307   : > { %v800_v30 = vpop.xlane.xlu0 %799  ;;  %v1590_v9 = vpop.eup %1589 }
 0x308   : > { %1599 = vpow2.f32 %v958_v27  ;;  %v890_v0 = vsub.f32 %v2030_v20, %v800_v30  ;;  %v891_v51 = vsub.f32 %v2032_v21, %v800_v30 }
 0x309   : > { %1601 = vpow2.f32 %v960_v24 }
 0x30a   : > { %v1592_v22 = vpop.eup %1591  ;;  %v962_v26 = vmul.f32 1.442695, %v890_v0  ;;  %v964_v13 = vmul.f32 1.442695, %v891_v51 }
 0x30b   : > { %v1594_v17 = vpop.eup %1593  ;;  %v803_v18 = vpop.xlane.xlu0 %802  ;;  %v1415_v10 = vpack.c.bf16 %v1592_v22, %v1588_v58 }
 0x30c   : > { %v892_v25 = vsub.f32 %v2036_v31, %v803_v18  ;;  %v893_v12 = vsub.f32 %v2038_v32, %v803_v18  ;;  %v1413_v2 = vpack.c.bf16 %v1594_v17, %v1590_v9  ;;  %1603 = vpow2.f32 %v962_v26 }
 0x30e   : > { %v966_v29 = vmul.f32 1.442695, %v892_v25  ;;  %v968_v20 = vmul.f32 1.442695, %v893_v12  ;;  %1414 = vmatprep.subr.bf16.mxu1 %v1413_v2  ;;  %1478 = vmatprep.subr.bf16.mxu0 %v1413_v2  ;;  %v1596_v27 = vpop.eup %1595 }
 0x30f   : > { %1416 = vmatpush1.bf16.xpose.msra.mxu1 %v1415_v10  ;;  %1480 = vmatpush1.bf16.msra.mxu0 %v1415_v10  ;;  %v806_v16 = vpop.xlane.xlu0 %805  ;;  %v1598_v30 = vpop.eup %1597 }
 0x310   : > { %1605 = vpow2.f32 %v966_v29  ;;  %v894_v21 = vsub.f32 %v2042_v34, %v806_v16  ;;  %v895_v24 = vsub.f32 %v2044_v35, %v806_v16 }
 0x311   : > { %1607 = vpow2.f32 %v968_v20 }
 0x312   : > { %v1600_v31 = vpop.eup %1599  ;;  %1609 = vpow2.f32 %v964_v13  ;;  %v970_v32 = vmul.f32 1.442695, %v894_v21  ;;  %v972_v0 = vmul.f32 1.442695, %v895_v24 }
 0x313   : > { %v1602_v58 = vpop.eup %1601  ;;  %v809_v9 = vpop.xlane.xlu0 %808  ;;  %v1419_v22 = vpack.c.bf16 %v1600_v31, %v1596_v27 }
 0x314   : > { %v896_v51 = vsub.f32 %v2048_v37, %v809_v9  ;;  %v897_v17 = vsub.f32 %v2050_v38, %v809_v9  ;;  %v1417_v26 = vpack.c.bf16 %v1602_v58, %v1598_v30  ;;  %1611 = vpow2.f32 %v970_v32 }
 0x315   : > { %1613 = vpow2.f32 %v972_v0 }
 0x316   : > { %v974_v18 = vmul.f32 1.442695, %v896_v51  ;;  %v976_v10 = vmul.f32 1.442695, %v897_v17  ;;  %1418 = vmatprep.subr.bf16.mxu1 %v1417_v26  ;;  %1482 = vmatprep.subr.bf16.mxu0 %v1417_v26  ;;  %v1604_v12 = vpop.eup %1603 }
 0x317   : > { %1420 = vmatpush1.bf16.xpose.msra.mxu1 %v1419_v22  ;;  %1484 = vmatpush1.bf16.msra.mxu0 %v1419_v22  ;;  %v812_v34 = vpop.xlane.xlu1 %811 }
 0x318   : > { %1615 = vpow2.f32 %v974_v18  ;;  %v898_v35 = vsub.f32 %v2054_v40, %v812_v34  ;;  %v899_v25 = vsub.f32 %v2056_v41, %v812_v34 }
 0x319   : > { %1617 = vpow2.f32 %v976_v10 }
 0x31a   : > { %v1606_v37 = vpop.eup %1605  ;;  %v978_v2 = vmul.f32 1.442695, %v898_v35  ;;  %v980_v13 = vmul.f32 1.442695, %v899_v25 }
 0x31b   : > { %v1608_v38 = vpop.eup %1607  ;;  %v815_v29 = vpop.xlane.xlu0 %814  ;;  %v1423_v20 = vpack.c.bf16 %v1606_v37, %v1604_v12 }
 0x31c   : > { %v1610_v16 = vpop.eup %1609  ;;  %v900_v27 = vsub.f32 %v2060_v43, %v815_v29  ;;  %v901_v21 = vsub.f32 %v2062_v44, %v815_v29  ;;  %1619 = vpow2.f32 %v978_v2 }
 0x31d   : > { %v1421_v24 = vpack.c.bf16 %v1608_v38, %v1610_v16  ;;  %1621 = vpow2.f32 %v980_v13 }
 0x31e   : > { %v982_v30 = vmul.f32 1.442695, %v900_v27  ;;  %v984_v40 = vmul.f32 1.442695, %v901_v21  ;;  %v1612_v31 = vpop.eup %1611 }
 0x31f   : > { %1422 = vmatprep.subr.bf16.mxu1 %v1421_v24  ;;  %1486 = vmatprep.subr.bf16.mxu0 %v1421_v24  ;;  %v818_v41 = vpop.xlane.xlu0 %817  ;;  %v1614_v58 = vpop.eup %1613 }
 0x320   : > { %1623 = vpow2.f32 %v982_v30  ;;  %1424 = vmatpush1.bf16.xpose.msra.mxu1 %v1423_v20  ;;  %1488 = vmatpush1.bf16.msra.mxu0 %v1423_v20  ;;  %v902_v32 = vsub.f32 %v2066_v46, %v818_v41  ;;  %v903_v43 = vsub.f32 %v2068_v47, %v818_v41 }
 0x321   : > { %1625 = vpow2.f32 %v984_v40 }
 0x322   : > { %v1616_v0 = vpop.eup %1615  ;;  %v986_v44 = vmul.f32 1.442695, %v902_v32  ;;  %v988_v22 = vmul.f32 1.442695, %v903_v43 }
 0x323   : > { %v1618_v9 = vpop.eup %1617  ;;  %v821_v51 = vpop.xlane.xlu0 %820  ;;  %v1427_v17 = vpack.c.bf16 %v1616_v0, %v1612_v31 }
 0x324   : > { %v904_v26 = vsub.f32 %v2072_v49, %v821_v51  ;;  %v905_v18 = vsub.f32 %v2074_v50, %v821_v51  ;;  %v1425_v10 = vpack.c.bf16 %v1618_v9, %v1614_v58  ;;  %1627 = vpow2.f32 %v986_v44 }
 0x325   : > { %1629 = vpow2.f32 %v988_v22 }
 0x326   : > { %v990_v34 = vmul.f32 1.442695, %v904_v26  ;;  %v992_v35 = vmul.f32 1.442695, %v905_v18  ;;  %1426 = vmatprep.subr.bf16.mxu1 %v1425_v10  ;;  %1490 = vmatprep.subr.bf16.mxu0 %v1425_v10  ;;  %v1620_v47 = vpop.eup %1619 }
 0x327   : > { %1492 = vmatpush1.bf16.msra.mxu0 %v1427_v17  ;;  %v824_v46 = vpop.xlane.xlu0 %823  ;;  %v1622_v37 = vpop.eup %1621 }
 0x328   : > { %1631 = vpow2.f32 %v990_v34  ;;  %1428 = vmatpush1.bf16.xpose.msra.mxu1 %v1427_v17  ;;  %v906_v25 = vsub.f32 %v2078_v52, %v824_v46  ;;  %v907_v12 = vsub.f32 %v2080_v53, %v824_v46 }
 0x329   : > { %1633 = vpow2.f32 %v992_v35 }
 0x32a   : > { %v1624_v49 = vpop.eup %1623  ;;  %v994_v50 = vmul.f32 1.442695, %v906_v25  ;;  %v996_v38 = vmul.f32 1.442695, %v907_v12 }
 0x32b   : > { %v1626_v2 = vpop.eup %1625  ;;  %v827_v13 = vpop.xlane.xlu0 %826  ;;  %v1431_v29 = vpack.c.bf16 %v1624_v49, %v1620_v47 }
 0x32c   : > { %v908_v20 = vsub.f32 %v2087_v56, %v827_v13  ;;  %v909_v16 = vsub.f32 %v2089_v57, %v827_v13  ;;  %v1429_v27 = vpack.c.bf16 %v1626_v2, %v1622_v37  ;;  %1635 = vpow2.f32 %v994_v50 }
 0x32d   : > { %1637 = vpow2.f32 %v996_v38 }
 0x32e   : > { %v998_v21 = vmul.f32 1.442695, %v908_v20  ;;  %v1000_v24 = vmul.f32 1.442695, %v909_v16  ;;  %1430 = vmatprep.subr.bf16.mxu1 %v1429_v27  ;;  %1494 = vmatprep.subr.bf16.mxu0 %v1429_v27  ;;  %v1628_v53 = vpop.eup %1627 }
 0x32f   : > { %1496 = vmatpush1.bf16.msra.mxu0 %v1431_v29  ;;  %v830_v52 = vpop.xlane.xlu0 %829  ;;  %v1630_v41 = vpop.eup %1629 }
 0x330   : > { %1639 = vpow2.f32 %v998_v21  ;;  %1432 = vmatpush1.bf16.xpose.msra.mxu1 %v1431_v29  ;;  %v910_v30 = vsub.f32 %v2096_v60, %v830_v52  ;;  %v911_v40 = vsub.f32 %v2098_v61, %v830_v52 }
 0x331   : > { %1641 = vpow2.f32 %v1000_v24 }
 0x332   : > { %v1632_v56 = vpop.eup %1631  ;;  %v1002_v57 = vmul.f32 1.442695, %v910_v30  ;;  %v1004_v32 = vmul.f32 1.442695, %v911_v40 }
 0x333   : > { %v1634_v31 = vpop.eup %1633  ;;  %v833_v58 = vpop.xlane.xlu0 %832  ;;  %v1435_v43 = vpack.c.bf16 %v1632_v56, %v1628_v53 }
 0x334   : > { %v912_v0 = vsub.f32 %v2102_v63, %v833_v58  ;;  %v913_v44 = vsub.f32 %v2104_v1, %v833_v58  ;;  %v1433_v9 = vpack.c.bf16 %v1634_v31, %v1630_v41  ;;  %1643 = vpow2.f32 %v1002_v57 }
 0x335   : > { %1645 = vpow2.f32 %v1004_v32 }
 0x336   : > { %v1006_v22 = vmul.f32 1.442695, %v912_v0  ;;  %v1008_v51 = vmul.f32 1.442695, %v913_v44  ;;  %1434 = vmatprep.subr.bf16.mxu1 %v1433_v9  ;;  %1498 = vmatprep.subr.bf16.mxu0 %v1433_v9  ;;  %v1636_v61 = vpop.eup %1635 }
 0x337   : > { %1500 = vmatpush1.bf16.msra.mxu0 %v1435_v43  ;;  %v836_v60 = vpop.xlane.xlu0 %835  ;;  %v1638_v18 = vpop.eup %1637 }
 0x338   : > { %1647 = vpow2.f32 %v1006_v22  ;;  %1436 = vmatpush1.bf16.xpose.msra.mxu1 %v1435_v43  ;;  %v914_v17 = vsub.f32 %v2108_v3, %v836_v60  ;;  %v915_v26 = vsub.f32 %v2110_v4, %v836_v60 }
 0x339   : > { %1649 = vpow2.f32 %v1008_v51 }
 0x33a   : > { %v1640_v63 = vpop.eup %1639  ;;  %v1010_v1 = vmul.f32 1.442695, %v914_v17  ;;  %v1012_v34 = vmul.f32 1.442695, %v915_v26 }
 0x33b   : > { %v1642_v10 = vpop.eup %1641  ;;  %v839_v35 = vpop.xlane.xlu0 %838  ;;  %v1439_v46 = vpack.c.bf16 %v1640_v63, %v1636_v61 }
 0x33c   : > { %v916_v47 = vsub.f32 %v2114_v6, %v839_v35  ;;  %v917_v25 = vsub.f32 %v2116_v7, %v839_v35  ;;  %v1437_v12 = vpack.c.bf16 %v1642_v10, %v1638_v18  ;;  %1651 = vpow2.f32 %v1010_v1 }
 0x33d   : > { %1653 = vpow2.f32 %v1012_v34 }
 0x33e   : > { %v1014_v37 = vmul.f32 1.442695, %v916_v47  ;;  %v1016_v49 = vmul.f32 1.442695, %v917_v25  ;;  %1438 = vmatprep.subr.bf16.mxu1 %v1437_v12  ;;  %1502 = vmatprep.subr.bf16.mxu0 %v1437_v12  ;;  %v1644_v4 = vpop.eup %1643 }
 0x33f   : > { %1504 = vmatpush1.bf16.msra.mxu0 %v1439_v46  ;;  %v842_v3 = vpop.xlane.xlu0 %841  ;;  %v1646_v38 = vpop.eup %1645 }
 0x340   : > { %1655 = vpow2.f32 %v1014_v37  ;;  %1440 = vmatpush1.bf16.xpose.msra.mxu1 %v1439_v46  ;;  %v918_v50 = vsub.f32 %v2120_v11, %v842_v3  ;;  %v919_v2 = vsub.f32 %v2122_v14, %v842_v3 }
 0x341   : > { %1657 = vpow2.f32 %v1016_v49 }
 0x342   : > { %v1648_v6 = vpop.eup %1647  ;;  %v1018_v7 = vmul.f32 1.442695, %v918_v50  ;;  %v1020_v29 = vmul.f32 1.442695, %v919_v2 }
 0x343   : > { %v1650_v13 = vpop.eup %1649  ;;  %v845_v20 = vpop.xlane.xlu0 %844  ;;  %v1443_v16 = vpack.c.bf16 %v1648_v6, %v1644_v4 }
 0x344   : > { %v920_v27 = vsub.f32 %v2126_v19, %v845_v20  ;;  %v921_v21 = vsub.f32 %v2128_v28, %v845_v20  ;;  %v1441_v24 = vpack.c.bf16 %v1650_v13, %v1646_v38  ;;  %1659 = vpow2.f32 %v1018_v7  ;;  %v2394_v7 = vld [vmem:[#allocation14_spill] sm:$0xff] }
 0x345   : > { %1661 = vpow2.f32 %v1020_v29  ;;  %v2395_v29 = vld [vmem:[#allocation15_spill] sm:$0xff] }
 0x346   : > { %v1022_v52 = vmul.f32 1.442695, %v920_v27  ;;  %v1024_v53 = vmul.f32 1.442695, %v921_v21  ;;  %1442 = vmatprep.subr.bf16.mxu1 %v1441_v24  ;;  %1506 = vmatprep.subr.bf16.mxu0 %v1441_v24  ;;  %v1652_v14 = vpop.eup %1651 }
 0x347   : > { %1508 = vmatpush1.bf16.msra.mxu0 %v1443_v16  ;;  %v848_v11 = vpop.xlane.xlu0 %847  ;;  %v1654_v41 = vpop.eup %1653 }
 0x348   : > { %1663 = vpow2.f32 %v1022_v52  ;;  %1444 = vmatpush1.bf16.xpose.msra.mxu1 %v1443_v16  ;;  %v922_v30 = vsub.f32 %v2132_v36, %v848_v11  ;;  %v923_v40 = vsub.f32 %v2134_v39, %v848_v11 }
 0x349   : > { %1665 = vpow2.f32 %v1024_v53  ;;  %v2396_v53 = vld [vmem:[#allocation16_spill] sm:$0xff] }
 0x34a   : > { %v1656_v19 = vpop.eup %1655  ;;  %v1026_v28 = vmul.f32 1.442695, %v922_v30  ;;  %v1028_v57 = vmul.f32 1.442695, %v923_v40 }
 0x34b   : > { %v1658_v56 = vpop.eup %1657  ;;  %v851_v31 = vpop.xlane.xlu0 %850  ;;  %v1447_v32 = vpack.c.bf16 %v1656_v19, %v1652_v14  ;;  %v2397_v14 = vld [vmem:[#allocation17_spill] sm:$0xff] }
 0x34c   : > { %v924_v58 = vsub.f32 %v2138_v45, %v851_v31  ;;  %v925_v43 = vsub.f32 %v2140_v48, %v851_v31  ;;  %v1445_v0 = vpack.c.bf16 %v1658_v56, %v1654_v41  ;;  %1667 = vpow2.f32 %v1026_v28 }
 0x34d   : > { %1669 = vpow2.f32 %v1028_v57  ;;  %v2398_v57 = vld [vmem:[#allocation18_spill] sm:$0xff] }
 0x34e   : > { %v1030_v44 = vmul.f32 1.442695, %v924_v58  ;;  %v1032_v9 = vmul.f32 1.442695, %v925_v43  ;;  %1446 = vmatprep.subr.bf16.mxu1 %v1445_v0  ;;  %1510 = vmatprep.subr.bf16.mxu0 %v1445_v0  ;;  %v1660_v39 = vpop.eup %1659 }
 0x34f   : > { %1512 = vmatpush1.bf16.msra.mxu0 %v1447_v32  ;;  %v854_v36 = vpop.xlane.xlu0 %853  ;;  %v1662_v60 = vpop.eup %1661 }
 0x350   : > { %1671 = vpow2.f32 %v1030_v44  ;;  %1448 = vmatpush1.bf16.xpose.msra.mxu1 %v1447_v32  ;;  %v926_v22 = vsub.f32 %v2144_v54, %v854_v36  ;;  %v927_v51 = vsub.f32 %v2146_v55, %v854_v36  ;;  %v2399_v32 = vld [vmem:[#allocation19_spill] sm:$0xff] }
 0x351   : > { %1673 = vpow2.f32 %v1032_v9 }
 0x352   : > { %v1664_v45 = vpop.eup %1663  ;;  %v1034_v48 = vmul.f32 1.442695, %v926_v22  ;;  %v1036_v17 = vmul.f32 1.442695, %v927_v51  ;;  %v2400_v51 = vld [vmem:[#allocation20_spill] sm:$0xff] }
 0x353   : > { %v1666_v61 = vpop.eup %1665  ;;  %v857_v26 = vpop.xlane.xlu0 %856  ;;  %v1451_v18 = vpack.c.bf16 %v1664_v45, %v1660_v39  ;;  %v2401_v45 = vld [vmem:[#allocation21_spill] sm:$0xff] }
 0x354   : > { %v928_v63 = vsub.f32 %v2150_v59, %v857_v26  ;;  %v929_v1 = vsub.f32 %v2152_v62, %v857_v26  ;;  %v1449_v10 = vpack.c.bf16 %v1666_v61, %v1662_v60  ;;  %1675 = vpow2.f32 %v1034_v48 }
 0x355   : > { %1677 = vpow2.f32 %v1036_v17 }
 0x356   : > { %v1038_v34 = vmul.f32 1.442695, %v928_v63  ;;  %v1040_v35 = vmul.f32 1.442695, %v929_v1  ;;  %1450 = vmatprep.subr.bf16.mxu1 %v1449_v10  ;;  %1514 = vmatprep.subr.bf16.mxu0 %v1449_v10  ;;  %v1668_v55 = vpop.eup %1667  ;;  %v2402_v1 = vld [vmem:[#allocation22_spill] sm:$0xff] }
 0x357   : > { %1516 = vmatpush1.bf16.msra.mxu0 %v1451_v18  ;;  %v860_v54 = vpop.xlane.xlu0 %859  ;;  %v1670_v25 = vpop.eup %1669 }
 0x358   : > { %1679 = vpow2.f32 %v1038_v34  ;;  %1452 = vmatpush1.bf16.xpose.msra.mxu1 %v1451_v18  ;;  %v930_v46 = vsub.f32 %v2156_v5, %v860_v54  ;;  %v931_v47 = vsub.f32 %v2158_v8, %v860_v54  ;;  %v2403_v34 = vld [vmem:[#allocation23_spill] sm:$0xff] }
 0x359   : > { %1681 = vpow2.f32 %v1040_v35 }
 0x35a   : > { %v1672_v59 = vpop.eup %1671  ;;  %v1042_v62 = vmul.f32 1.442695, %v930_v46  ;;  %v1044_v37 = vmul.f32 1.442695, %v931_v47 }
 0x35b   : > { %v1674_v12 = vpop.eup %1673  ;;  %v863_v49 = vpop.xlane.xlu0 %862  ;;  %v1455_v3 = vpack.c.bf16 %v1672_v59, %v1668_v55 }
 0x35c   : > { %v932_v4 = vsub.f32 %v2162_v33, %v863_v49  ;;  %v933_v50 = vsub.f32 %v2164_v42, %v863_v49  ;;  %v1453_v2 = vpack.c.bf16 %v1674_v12, %v1670_v25  ;;  %1683 = vpow2.f32 %v1042_v62 }
 0x35d   : > { %1685 = vpow2.f32 %v1044_v37  ;;  %v2404_v37 = vld [vmem:[#allocation24_spill] sm:$0xff] }
 0x35e   : > { %v1046_v38 = vmul.f32 1.442695, %v932_v4  ;;  %v1048_v6 = vmul.f32 1.442695, %v933_v50  ;;  %1454 = vmatprep.subr.bf16.mxu1 %v1453_v2  ;;  %1518 = vmatprep.subr.bf16.mxu0 %v1453_v2  ;;  %v1676_v8 = vpop.eup %1675 }
 0x35f   : > { %1520 = vmatpush1.bf16.msra.mxu0 %v1455_v3  ;;  %v866_v5 = vpop.xlane.xlu0 %865  ;;  %v1678_v16 = vpop.eup %1677 }
 0x360   : > { %1687 = vpow2.f32 %v1046_v38  ;;  %1456 = vmatpush1.bf16.xpose.msra.mxu1 %v1455_v3  ;;  %v934_v13 = vsub.f32 %v2394_v7, %v866_v5  ;;  %v935_v20 = vsub.f32 %v2395_v29, %v866_v5 }
 0x361   : > { %1689 = vpow2.f32 %v1048_v6 }
 0x362   : > { %v1680_v33 = vpop.eup %1679  ;;  %v1050_v42 = vmul.f32 1.442695, %v934_v13  ;;  %v1052_v21 = vmul.f32 1.442695, %v935_v20 }
 0x363   : > { %v1682_v27 = vpop.eup %1681  ;;  %v869_v24 = vpop.xlane.xlu0 %868  ;;  %v1459_v52 = vpack.c.bf16 %v1680_v33, %v1676_v8 }
 0x364   : > { %v936_v11 = vsub.f32 %v2396_v53, %v869_v24  ;;  %v937_v30 = vsub.f32 %v2397_v14, %v869_v24  ;;  %v1457_v40 = vpack.c.bf16 %v1682_v27, %v1678_v16  ;;  %1691 = vpow2.f32 %v1050_v42  ;;  %v226_v24 = vpop.permute.xlu1 %225 }
 0x365   : > { %1693 = vpow2.f32 %v1052_v21  ;;  %v1147_v27 = vlaneseq }
 0x366   : > { %v1054_v41 = vmul.f32 1.442695, %v936_v11  ;;  %v1056_v19 = vmul.f32 1.442695, %v937_v30  ;;  %1458 = vmatprep.subr.bf16.mxu1 %v1457_v40  ;;  %1522 = vmatprep.subr.bf16.mxu0 %v1457_v40  ;;  %v1684_v56 = vpop.eup %1683 }
 0x367   : > { %1524 = vmatpush1.bf16.msra.mxu0 %v1459_v52  ;;  %v872_v28 = vpop.xlane.xlu0 %871  ;;  %v1686_v43 = vpop.eup %1685  ;;  %v1148_v53 = vshrl.u32 %v1147_v27, 7 }
 0x368   : > { %1695 = vpow2.f32 %v1054_v41  ;;  %1460 = vmatpush1.bf16.xpose.msra.mxu1 %v1459_v52  ;;  %v938_v31 = vsub.f32 %v2398_v57, %v872_v28  ;;  %v939_v58 = vsub.f32 %v2399_v32, %v872_v28  ;;  %v236_v14 = vpop.permute.xlu1 %235  ;;  %v2405_v41 = vld [vmem:[#allocation8_spill] sm:$0xff]  ;;  %v2406_v28 = vld [vmem:[#allocation9_spill] sm:$0xff] }
 0x369   : > { %1697 = vpow2.f32 %v1056_v19  ;;  %v1149_v11 = vsub.s32 0, %v1148_v53  ;;  %v340_v19 = vadd.f32 %v2405_v41, %v226_v24 }
 0x36a   : > { %v1688_v0 = vpop.eup %1687  ;;  %v1058_v44 = vmul.f32 1.442695, %v938_v31  ;;  %v1060_v36 = vmul.f32 1.442695, %v939_v58  ;;  %v2407_v31 = vld [vmem:[#allocation12_spill] sm:$0xff] }
 0x36b   : > { %v1690_v9 = vpop.eup %1689  ;;  %v875_v39 = vpop.xlane.xlu0 %874  ;;  %v1463_v22 = vpack.c.bf16 %v1688_v0, %v1684_v56  ;;  %v342_v56 = vadd.f32 %v2406_v28, %v226_v24  ;;  %v352_v32 = vadd.f32 %v2407_v31, %v236_v14 }
 0x36c   : > { %v940_v60 = vsub.f32 %v2400_v51, %v875_v39  ;;  %v941_v48 = vsub.f32 %v2401_v45, %v875_v39  ;;  %v1461_v61 = vpack.c.bf16 %v1690_v9, %v1686_v43  ;;  %1699 = vpow2.f32 %v1058_v44  ;;  %v2409_v43 = vld [vmem:[#allocation10_spill] sm:$0xff]  ;;  %v2410_v9 = vld [vmem:[#allocation13_spill] sm:$0xff]  ;;  %v2411_v39 = vld [vmem:[#allocation7_spill] sm:$0xff] }
 0x36d   : > { %1701 = vpow2.f32 %v1060_v36  ;;  %v354_v36 = vadd.f32 %v2410_v9, %v236_v14  ;;  %v2412_v51 = vld [vmem:[#allocation11_spill] sm:$0xff] }
 0x36e   : > { %v1062_v17 = vmul.f32 1.442695, %v940_v60  ;;  %v1064_v26 = vmul.f32 1.442695, %v941_v48  ;;  %1462 = vmatprep.subr.bf16.mxu1 %v1461_v61  ;;  %1526 = vmatprep.subr.bf16.mxu0 %v1461_v61  ;;  %v1692_v63 = vpop.eup %1691 }
 0x36f   : > { %1528 = vmatpush1.bf16.msra.mxu0 %v1463_v22  ;;  %v878_v18 = vpop.xlane.xlu0 %877  ;;  %v1694_v54 = vpop.eup %1693 }
 0x370   : > { %1703 = vpow2.f32 %v1062_v17  ;;  %1464 = vmatpush1.bf16.xpose.msra.mxu1 %v1463_v22  ;;  %v942_v10 = vsub.f32 %v2402_v1, %v878_v18  ;;  %v943_v35 = vsub.f32 %v2403_v34, %v878_v18  ;;  %v1252_v34 = vstv %s197_s14 }
 0x371   : > { %1705 = vpow2.f32 %v1064_v26 }
 0x372   : > { %v1696_v55 = vpop.eup %1695  ;;  %v1066_v46 = vmul.f32 1.442695, %v942_v10  ;;  %v1068_v25 = vmul.f32 1.442695, %v943_v35 }
 0x373   : > { %v1698_v47 = vpop.eup %1697  ;;  %v881_v59 = vpop.xlane.xlu0 %880  ;;  %v1467_v62 = vpack.c.bf16 %v1696_v55, %v1692_v63 }
 0x374   : > { %v944_v12 = vsub.f32 %v2198_v23, %v881_v59  ;;  %v945_v49 = vsub.f32 %v2404_v37, %v881_v59  ;;  %v1465_v3 = vpack.c.bf16 %v1698_v47, %v1694_v54  ;;  %1707 = vpow2.f32 %v1066_v46  ;;  %v1719_v47 = vld [vmem:[%s1887_s10] sm:$0xff]  ;;  %v1720_v59 = vld [vmem:[%s1887_s10 + $0x8] sm:$0xff] }
 0x375   : > { %1709 = vpow2.f32 %v1068_v25 }
 0x376   : > { %v1070_v4 = vmul.f32 1.442695, %v944_v12  ;;  %v1072_v50 = vmul.f32 1.442695, %v945_v49  ;;  %1466 = vmatprep.subr.bf16.mxu1 %v1465_v3  ;;  %1530 = vmatprep.subr.bf16.mxu0 %v1465_v3  ;;  %v1700_v2 = vpop.eup %1699 }
 0x377   : > { %1532 = vmatpush1.bf16.msra.mxu0 %v1467_v62  ;;  %v1702_v38 = vpop.eup %1701 }
 0x378   : > { %1711 = vpow2.f32 %v1070_v4  ;;  %1468 = vmatpush1.bf16.xpose.msra.mxu1 %v1467_v62  ;;  %v1721_v4 = vld [vmem:[%s1887_s10 + $0x10] sm:$0xff] }
 0x379   : > { %1713 = vpow2.f32 %v1072_v50 }
 0x37a   : > { %v1704_v6 = vpop.eup %1703 }
 0x37b   : > { %v1706_v5 = vpop.eup %1705  ;;  %v1471_v8 = vpack.c.bf16 %v1704_v6, %v1700_v2  ;;  %v221_v52 = vpop.permute.xlu0 %220  ;;  %v1722_v2 = vld [vmem:[%s1887_s10 + $0x18] sm:$0xff] }
 0x37c   : > { %v1469_v7 = vpack.c.bf16 %v1706_v5, %v1702_v38  ;;  %v336_v22 = vadd.f32 %v2411_v39, %v221_v52 }
 0x37e   : > { %1470 = vmatprep.subr.bf16.mxu1 %v1469_v7  ;;  %1534 = vmatprep.subr.bf16.mxu0 %v1469_v7  ;;  %v1708_v23 = vpop.eup %1707 }
 0x37f   : > { %1536 = vmatpush1.bf16.msra.mxu0 %v1471_v8  ;;  %v1710_v13 = vpop.eup %1709  ;;  %v231_v30 = vpop.permute.xlu0 %230 }
 0x380   : > { %1472 = vmatpush1.bf16.xpose.msra.mxu1 %v1471_v8  ;;  %v346_v0 = vadd.f32 %v2409_v43, %v231_v30  ;;  %v348_v60 = vadd.f32 %v2412_v51, %v231_v30 }
 0x382   : > { %v1712_v29 = vpop.eup %1711 }
 0x383   : > { %v1714_v20 = vpop.eup %1713  ;;  %v1475_v16 = vpack.c.bf16 %v1712_v29, %v1708_v23  ;;  %v1723_v23 = vld [vmem:[%s1887_s10 + $0x20] sm:$0xff]  ;;  %v1724_v29 = vld [vmem:[%s1887_s10 + $0x28] sm:$0xff] }
 0x384   : > { %v1473_v33 = vpack.c.bf16 %v1714_v20, %v1710_v13 }
 0x386   : > { %1474 = vmatprep.subr.bf16.mxu1 %v1473_v33  ;;  %1538 = vmatprep.subr.bf16.mxu0 %v1473_v33 }
 0x387   : > { %1540 = vmatpush1.bf16.msra.mxu0 %v1475_v16 }
 0x388   : > { %1476 = vmatpush1.bf16.xpose.msra.mxu1 %v1475_v16 }
 0x38f   : > { %1139 = vmatmul.mubr.f32.vlgmr.msra.gmra.mrb[64].mxu1 %v1793_v15  ;;  %v2408_v15 = vld [vmem:[#allocation6_spill] sm:$0xff] }
 0x390   : > { %v334_v58 = vadd.f32 %v2408_v15, %v221_v52  ;;  %v1726_v52 = vld [vmem:[%s1887_s10 + $0x38] sm:$0xff] }
 0x462   : > { %v1140_v42 = vpop.f32.mrb[64].mxu1 }
 0x463   : > { %1715 = vrcp.f32 %v1140_v42  ;;  %v1142_v21 = vpop.f32.mrb[65].mxu1 }
 0x464   : > { %1717 = vrcp.f32 %v1142_v21  ;;  %v1725_v21 = vld [vmem:[%s1887_s10 + $0x30] sm:$0xff] }
 0x46d   : > { %v1716_v40 = vpop.eup %1715 }
 0x46e   : > { %v1718_v57 = vpop.eup %1717  ;;  %v1150_v44 = vrot.slane %v1716_v40, %v1149_v11 }
 0x46f   : > { %v1154_v45 = vrot.slane %v1718_v57, %v1149_v11 }
 0x470   : > { %v1155_v48 = vmul.f32 %v1150_v44, %v334_v58  ;;  %v1157_v61 = vmul.f32 %v1150_v44, %v340_v19  ;;  %v1159_v17 = vmul.f32 %v1150_v44, %v346_v0  ;;  %v1161_v26 = vmul.f32 %v1150_v44, %v352_v32 }
 0x471   : > { %v1156_v18 = vmul.f32 %v1154_v45, %v336_v22  ;;  %v1158_v63 = vmul.f32 %v1154_v45, %v342_v56  ;;  %v1160_v1 = vmul.f32 %v1154_v45, %v348_v60  ;;  %v1162_v10 = vmul.f32 %v1154_v45, %v354_v36 }
 0x473   : > { %1227 = vmatprep.mubr.f32.mxu0 %v1156_v18 }
 0x474   : > { %1228 = vmatmul.mubr.f32.vlgmr.msra.gmra.mrb[12].mxu0 %v1155_v48 }
 0x475   : > { %1233 = vmatprep.mubr.f32.mxu0 %v1158_v63 }
 0x478   : > { %1234 = vmatmul.mubr.f32.gmra.mrb[14].mxu0 %v1157_v61 }
 0x479   : > { %1239 = vmatprep.mubr.f32.mxu0 %v1160_v1 }
 0x47c   : > { %1240 = vmatmul.mubr.f32.gmra.mrb[16].mxu0 %v1159_v17 }
 0x47d   : > { %1245 = vmatprep.mubr.f32.mxu0 %v1162_v10 }
 0x480   : > { %1246 = vmatmul.mubr.f32.gmra.mrb[18].mxu0 %v1161_v26 }
 0x547   : > { %v1229_v35 = vpop.f32.mrb[12].mxu0 }
 0x548   : > { %v1253_v54 = vmul.f32 %v1252_v34, %v1229_v35  ;;  %v1231_v55 = vpop.f32.mrb[13].mxu0 }
 0x549   : > { %v1254_v46 = vmul.f32 %v1252_v34, %v1231_v55 }
 0x54a   : > { %v1261_v25 = vadd.f32 %v1719_v47, %v1253_v54 }
 0x54b   : > { %v1262_v62 = vadd.f32 %v1720_v59, %v1254_v46  ;;  %v1235_v12 = vpop.f32.mrb[14].mxu0 }
 0x54c   : > { %1269 = vst [vmem:[%s2289_s21] sm:$0xff] %v1261_v25  ;;  %v1255_v37 = vmul.f32 %v1252_v34, %v1235_v12  ;;  %v1237_v49 = vpop.f32.mrb[15].mxu0 }
 0x54d   : > { %1270 = vst [vmem:[%s2289_s21 + $0x8] sm:$0xff] %v1262_v62  ;;  %v1256_v3 = vmul.f32 %v1252_v34, %v1237_v49 }
 0x54e   : > { %v1263_v50 = vadd.f32 %v1721_v4, %v1255_v37 }
 0x54f   : > { %v1264_v38 = vadd.f32 %v1722_v2, %v1256_v3  ;;  %v1241_v6 = vpop.f32.mrb[16].mxu0 }
 0x550   : > { %1271 = vst [vmem:[%s2289_s21 + $0x10] sm:$0xff] %v1263_v50  ;;  %v1257_v5 = vmul.f32 %v1252_v34, %v1241_v6  ;;  %v1243_v8 = vpop.f32.mrb[17].mxu0 }
 0x551   : > { %1272 = vst [vmem:[%s2289_s21 + $0x18] sm:$0xff] %v1264_v38  ;;  %v1258_v7 = vmul.f32 %v1252_v34, %v1243_v8 }
 0x552   : > { %v1265_v13 = vadd.f32 %v1723_v23, %v1257_v5 }
 0x553   : > { %v1266_v20 = vadd.f32 %v1724_v29, %v1258_v7  ;;  %v1247_v16 = vpop.f32.mrb[18].mxu0 }
 0x554   : > { %1273 = vst [vmem:[%s2289_s21 + $0x20] sm:$0xff] %v1265_v13  ;;  %v1259_v33 = vmul.f32 %v1252_v34, %v1247_v16  ;;  %v1249_v42 = vpop.f32.mrb[19].mxu0 }
 0x555   : > { %1274 = vst [vmem:[%s2289_s21 + $0x28] sm:$0xff] %v1266_v20  ;;  %v1260_v27 = vmul.f32 %v1252_v34, %v1249_v42 }
 0x556   : > { %v1267_v24 = vadd.f32 %v1725_v21, %v1259_v33 }
 0x557   : > { %v1268_v53 = vadd.f32 %v1726_v52, %v1260_v27 }
 0x558   : > { %1275 = vst [vmem:[%s2289_s21 + $0x30] sm:$0xff] %v1267_v24 }
 0x559   : > { %1276 = vst [vmem:[%s2289_s21 + $0x38] sm:$0xff] %v1268_v53 }
 0x55a   : > { %1740 = shalt.err (!%p1737_p3)
}
 0x55b   : > { %s1741_s10 = scalar_lea.hbm %s2307_s30, 1024  ;;  %s1745_s12 = scalar_lea.hbm %s2361_s4, 2048 }
 0x55c   : > { %p1742_p4 = scmp.ne.s32.totalorder %s2307_s30, %s1741_s10  ;;  %p1746_p9 = scmp.lt.u32.totalorder %s2307_s30, %s2361_s4 }
 0x55d   : > { %p1747_p10 = scmp.lt.u32.totalorder %s1745_s12, %s1741_s10  ;;  %p1749_p12 = scmp.lt.u32.totalorder %s1741_s10, %s2307_s30 }
 0x55e   : > { %p1743_p7 = pnand %p1742_p4, %p1863_p5 }
 0x55f   : > { %p1748_p11 = por %p1747_p10, %p1746_p9 }
 0x560   : > { %p1744_p8 = pneg %p1743_p7 }
 0x561   : > { %p1750_p13 = por %p1749_p12, %p1748_p11 }
 0x563   : > { %p1751_p0 = pnand %p1750_p13, %p1744_p8 }
 0x565   : > { %1754 = shalt.err (!%p1751_p0)
}
 0x566   : > { %s1795_s15 = smov 256   ;;  %s1796_s16 = smov 16  }
 0x567   : > { %1541 = dma.vmem_to_hbm [thread:$0]  (%p1863_p5), %s2309_s24, 1024, %s2307_s30, %s2316_s0, %s1795_s15, %s1795_s15, %s1796_s16  }
 0x568 PF: > { %p1547_p1 = scmp.ge.s32.totalorder %s1789_s20, 2  ;;  %s1306_s21 = sand.u32 1, %s1777_s17  }
 0x569   : > { %s1307_s23 = scalar_lea.sflag [#allocation4], %s1306_s21 }
 0x56a   : > { %p1544_p2 = pnand %p1547_p1, %p1867_p6 }
 0x56c   : > { %1772 = dma.done.wait (!%p1544_p2), %s1307_s23, 1024  }
 0x56d   : > { %1774 = vsyncadd (!%p1544_p2), %s1307_s23, 4294966272  ;;  %p15_p3 = scmp.ge.s32.totalorder %s1850_s22, 4   ;;  %s2413_s17 = smov %s1781_s18 }
 0x56e   : > { %s2414_s18 = smov %s1785_s19  ;;  %s2415_s19 = smov %s1861_s25 }
 0x56f   : > { %s2416_s20 = smov %s1850_s22  ;;  %17 = sbr.rel (!%p15_p3) target bundleno = 5 (0x5), region = 71 }
 0x576   :  { %1312 = vsyncpa [#allocation4], 1 }
 0x577   :  { %1314 = vsyncpa [#allocation4 + $0x1], 1 }

</bundles_post_ra>
